<compile_context>
chip_gen: v6e
topology: v6e:2x2x1
jax: 0.10.0
libtpu: 0.0.40
codegen_flags: <defaults>
</compile_context>

<pallas_src>
import math
from functools import partial

import numpy as np
import jax
import jax.numpy as jnp
from jax.experimental import pallas as pl
from jax.experimental.pallas import tpu as pltpu


# ------------------------------------------------------------------ helpers --

def _hann_window(win_length, dtype=jnp.float32):
    # torch.hann_window(win_length, periodic=True)
    n = jnp.arange(win_length, dtype=dtype)
    return 0.5 - 0.5 * jnp.cos(2.0 * jnp.pi * n / win_length)


def _windowed_dft_matrices(n_fft, window, n_freq_pad, dtype):
    """Forward / inverse rDFT matrices with the analysis/synthesis window folded in,
    packed as [re | im] along a lane-padded frequency axis."""
    n_freq = n_fft // 2 + 1
    pad_c = n_freq_pad - n_freq

    k = np.arange(n_fft)[:, None]
    f = np.arange(n_freq)[None, :]
    ang = 2.0 * np.pi * k * f / n_fft                               # (n_fft, n_freq)
    cos_f = jnp.asarray(np.cos(ang), jnp.float32) * window[:, None]
    sin_f = jnp.asarray(-np.sin(ang), jnp.float32) * window[:, None]
    w_fwd = jnp.concatenate([jnp.pad(cos_f, ((0, 0), (0, pad_c))),
                             jnp.pad(sin_f, ((0, 0), (0, pad_c)))], axis=1)

    scale = np.full((n_freq,), 2.0, np.float32)
    scale[0] = 1.0
    if n_fft % 2 == 0:
        scale[-1] = 1.0
    ang_i = 2.0 * np.pi * np.arange(n_freq)[:, None] * np.arange(n_fft)[None, :] / n_fft
    cos_i = jnp.asarray(scale[:, None] * np.cos(ang_i) / n_fft, jnp.float32) * window[None, :]
    sin_i = jnp.asarray(-scale[:, None] * np.sin(ang_i) / n_fft, jnp.float32) * window[None, :]
    w_inv = jnp.concatenate([jnp.pad(cos_i, ((0, pad_c), (0, 0))),
                             jnp.pad(sin_i, ((0, pad_c), (0, 0)))], axis=0)

    return w_fwd.astype(dtype), w_inv.astype(dtype)


def _hw_params():
    """Generation-aware VMEM budgets.  v5e/v6e have 128 MiB VMEM per core, v7x 64 MiB.
    Unknown / query failure falls back to the conservative (v7x-safe) numbers."""
    cap = 64 * 1024 * 1024
    try:
        info = pltpu.get_tpu_info()
        cap = int(getattr(info, "vmem_capacity_bytes", cap))
    except Exception:
        pass
    if cap >= 120 * 1024 * 1024:           # v5e / v6e
        return {"budget": 80 * 1024 * 1024,
                "vmem_limit": 100 * 1024 * 1024,
                "tm_cap": 1024}
    return {"budget": 36 * 1024 * 1024,    # v7x or unknown
            "vmem_limit": 48 * 1024 * 1024,
            "tm_cap": 512}


def _choose_tile_m(M, n_fft, n_freq_pad, cd_bytes, budget, tm_cap):
    """Largest TM (multiple of 16, <= tm_cap) s.t. double-buffered tiles + the
    resident (double-buffered) DFT matrix fit the generation-aware VMEM budget,
    while keeping >= ~4 grid steps for megacore sharding / DMA pipelining."""
    F2 = 2 * n_freq_pad
    resident = 2 * n_fft * F2 * cd_bytes                       # double-buffered weights
    per_row_istft = 2 * (2 * F2 * cd_bytes + n_fft * 4)        # mag2 + ang in, f32 frames out
    per_row_stft = 2 * (n_fft * cd_bytes + 2 * F2 * 4 + F2 * cd_bytes)
    per_row = max(per_row_istft, per_row_stft)
    avail = max(budget - resident, 1 << 20)
    tm = int(avail // per_row) // 16 * 16
    tm = max(16, min(tm_cap, tm))
    tm = min(tm, max(16, (-(-M // 4) + 15) // 16 * 16))        # aim for >= ~4 grid steps
    return tm


# ------------------------------------------------------------ Pallas kernels --

def _istft_kernel(mag2_ref, ang_ref, w_ref, out_ref):
    # mag2: (TM, 2*Fp) pre-packed [mag|mag], ang: (TM, 2*Fp) packed [re|im],
    # w: (2*Fp, n_fft) window-folded inverse DFT.  One fused mul + one MXU dot.
    s = mag2_ref[...] * ang_ref[...]
    out_ref[...] = jnp.dot(s, w_ref[...], preferred_element_type=jnp.float32)


def _stft_phase_kernel(momentum, frames_ref, w_ref, tprev_ref, reb_ref, ang_ref):
    # frames: (TM, n_fft) already in compute dtype, w: (n_fft, 2*Fp) [cos|-sin],
    # tprev: (TM, 2*Fp) previous rebuilt spectrum (f32).  Emits rebuilt (f32)
    # + momentum-normalised angles (compute dtype) in one pass.
    reb = jnp.dot(frames_ref[...], w_ref[...], preferred_element_type=jnp.float32)
    reb_ref[...] = reb
    a = reb - momentum * tprev_ref[...]
    Fp = a.shape[-1] // 2
    ar = a[:, :Fp]
    ai = a[:, Fp:]
    inv = jax.lax.rsqrt(ar * ar + ai * ai + 1e-16)
    ang_ref[:, :Fp] = (ar * inv).astype(ang_ref.dtype)
    ang_ref[:, Fp:] = (ai * inv).astype(ang_ref.dtype)


# ---------------------------------------------------------- Pallas wrappers --

def pallas_istft(mag2, ang, w_inv, tm, vmem_limit):
    Mp, F2 = mag2.shape
    _, n_fft = w_inv.shape
    isz = jnp.dtype(mag2.dtype).itemsize
    cost = pl.CostEstimate(
        flops=int(2 * Mp * F2 * n_fft + Mp * F2),
        transcendentals=0,
        bytes_accessed=int(2 * Mp * F2 * isz + F2 * n_fft * isz + Mp * n_fft * 4))
    return pl.pallas_call(
        _istft_kernel,
        grid=(Mp // tm,),
        in_specs=[pl.BlockSpec((tm, F2), lambda i: (i, 0)),
                  pl.BlockSpec((tm, F2), lambda i: (i, 0)),
                  pl.BlockSpec((F2, n_fft), lambda i: (0, 0))],   # VMEM-resident weights
        out_specs=pl.BlockSpec((tm, n_fft), lambda i: (i, 0)),
        out_shape=jax.ShapeDtypeStruct((Mp, n_fft), jnp.float32),
        compiler_params=pltpu.CompilerParams(
            dimension_semantics=("parallel",),
            vmem_limit_bytes=vmem_limit),
        cost_estimate=cost,
    )(mag2, ang, w_inv)


def pallas_stft_phase(frames, tprev, w_fwd, momentum, tm, vmem_limit):
    Mp, n_fft = frames.shape
    F2 = w_fwd.shape[1]
    isz = jnp.dtype(frames.dtype).itemsize
    cost = pl.CostEstimate(
        flops=int(2 * Mp * n_fft * F2 + 8 * Mp * F2),
        transcendentals=int(Mp * (F2 // 2)),
        bytes_accessed=int(Mp * n_fft * isz + n_fft * F2 * isz
                           + Mp * F2 * (4 + 4 + isz)))
    kern = partial(_stft_phase_kernel, float(momentum))
    return pl.pallas_call(
        kern,
        grid=(Mp // tm,),
        in_specs=[pl.BlockSpec((tm, n_fft), lambda i: (i, 0)),
                  pl.BlockSpec((n_fft, F2), lambda i: (0, 0)),    # VMEM-resident weights
                  pl.BlockSpec((tm, F2), lambda i: (i, 0))],
        out_specs=(pl.BlockSpec((tm, F2), lambda i: (i, 0)),
                   pl.BlockSpec((tm, F2), lambda i: (i, 0))),
        out_shape=(jax.ShapeDtypeStruct((Mp, F2), jnp.float32),
                   jax.ShapeDtypeStruct((Mp, F2), frames.dtype)),
        input_output_aliases={2: 0},                              # tprev buffer -> reb
        compiler_params=pltpu.CompilerParams(
            dimension_semantics=("parallel",),
            vmem_limit_bytes=vmem_limit),
        cost_estimate=cost,
    )(frames, w_fwd, tprev)


# ------------------------------------------------------------- Griffin-Lim --

def griffinlim(specgram, window, n_fft, hop_length, win_length, power,
               n_iter, momentum, length, rand_init, *,
               use_pallas=True, compute_dtype=jnp.bfloat16):
    if not 0 <= momentum < 1:
        raise ValueError("momentum must be in range [0, 1)")
    momentum = momentum / (1 + momentum)

    shape = specgram.shape
    spec = specgram.reshape((-1,) + shape[-2:]).astype(jnp.float32)
    B, n_freq, T = spec.shape
    assert n_freq == n_fft // 2 + 1

    # centre-pad the window to n_fft, as torch.stft/istft do
    window = window.astype(jnp.float32)
    if win_length < n_fft:
        left = (n_fft - win_length) // 2
        window = jnp.pad(window, (left, n_fft - win_length - left))

    mag = spec ** (1.0 / power)                                  # (B, n_freq, T)
    start = n_fft // 2
    full_len = n_fft + hop_length * (T - 1)

    # ----- framing / overlap-add glue (strided path when hop | n_fft) -----
    # TODO(synk): the scatter/gather fallback (hop not dividing n_fft) is slow on TPU.
    R = n_fft // hop_length if n_fft % hop_length == 0 else None

    def overlap_add(frames):                                     # (b, T, n_fft) -> (b, full_len)
        b = frames.shape[0]
        if R is not None:
            f4 = frames.reshape(b, T, R, hop_length)
            acc = None
            for r in range(R):
                piece = jnp.pad(f4[:, :, r, :], ((0, 0), (r, R - 1 - r), (0, 0)))
                acc = piece if acc is None else acc + piece
            return acc.reshape(b, (T + R - 1) * hop_length)
        ola_idx = (jnp.arange(T) * hop_length)[:, None] + jnp.arange(n_fft)[None, :]
        return jnp.zeros((b, full_len), jnp.float32).at[:, ola_idx].add(frames)

    env = overlap_add(jnp.broadcast_to(window ** 2, (1, T, n_fft)))[0]
    env = env[start:full_len - start]
    # TODO(synk): torchaudio masks near-zero window-envelope bins; we use a tiny floor.
    inv_env = 1.0 / jnp.maximum(env, 1e-30)

    def gather_frames(padded):                                   # (B, L) -> (B, n_frames, n_fft)
        L = padded.shape[1]
        n_frames = 1 + (L - n_fft) // hop_length
        if R is not None:
            need = (n_frames - 1) * hop_length + n_fft
            chunks = padded[:, :need].reshape(B, need // hop_length, hop_length)
            frames = jnp.stack([chunks[:, r:r + n_frames] for r in range(R)], axis=2)
            return frames.reshape(B, n_frames, n_fft)
        f_idx = (jnp.arange(n_frames) * hop_length)[:, None] + jnp.arange(n_fft)[None, :]
        return padded[:, f_idx]

    def finalize_wave(frames):                                   # (B, T, n_fft) -> (B, out_len)
        y = overlap_add(frames)
        y = y[:, start:full_len - start] * inv_env
        if length is not None:
            if length <= y.shape[1]:
                y = y[:, :length]
            else:
                y = jnp.pad(y, ((0, 0), (0, length - y.shape[1])))
        return y

    # --------------------------------------------------- pure-JAX reference path --
    if not use_pallas:
        mag_bt = jnp.transpose(mag, (0, 2, 1))                    # (B, T, n_freq)
        if rand_init:
            k1, k2 = jax.random.split(jax.random.PRNGKey(0))
            ang_re = jax.random.uniform(k1, (B, T, n_freq), jnp.float32)
            ang_im = jax.random.uniform(k2, (B, T, n_freq), jnp.float32)
        else:
            ang_re = jnp.ones((B, T, n_freq), jnp.float32)
            ang_im = jnp.zeros((B, T, n_freq), jnp.float32)
        tprev_re = jnp.zeros_like(ang_re)
        tprev_im = jnp.zeros_like(ang_im)

        def istft_ref(a_re, a_im):
            sc = mag_bt * (a_re + 1j * a_im)
            frames = jnp.fft.irfft(sc, n=n_fft, axis=-1).astype(jnp.float32) * window
            return finalize_wave(frames)

        def stft_ref(wave):
            padded = jnp.pad(wave, ((0, 0), (start, start)), mode="reflect")
            frames = gather_frames(padded) * window
            sp = jnp.fft.rfft(frames, n=n_fft, axis=-1)
            return sp.real.astype(jnp.float32), sp.imag.astype(jnp.float32)

        for _ in range(n_iter):
            wave = istft_ref(ang_re, ang_im)
            rr, ri = stft_ref(wave)
            ar = rr - momentum * tprev_re
            ai = ri - momentum * tprev_im
            inv = 1.0 / (jnp.sqrt(ar * ar + ai * ai) + 1e-16)
            ang_re, ang_im = ar * inv, ai * inv
            tprev_re, tprev_im = rr, ri
        wave = istft_ref(ang_re, ang_im)
        return wave.reshape(shape[:-2] + (wave.shape[-1],))

    # ----------------------------------------------------------- Pallas fast path --
    hw = _hw_params()
    vmem_limit = hw["vmem_limit"]
    Fp = max(128, -(-n_freq // 128) * 128)                        # lane-pad n_freq
    F2 = 2 * Fp
    M = B * T
    cd_bytes = jnp.dtype(compute_dtype).itemsize
    TM = _choose_tile_m(M, n_fft, Fp, cd_bytes, hw["budget"], hw["tm_cap"])
    Mp = -(-M // TM) * TM                                         # row-pad M to tile

    w_fwd, w_inv = _windowed_dft_matrices(n_fft, window, Fp, compute_dtype)

    mag2d = jnp.transpose(mag, (0, 2, 1)).reshape(M, n_freq)
    # pre-pack [mag | mag] once (outside the loop) in the compute dtype
    magp2 = jnp.zeros((Mp, F2), jnp.float32)
    magp2 = magp2.at[:M, :n_freq].set(mag2d).at[:M, Fp:Fp + n_freq].set(mag2d)
    magp2 = magp2.astype(compute_dtype)

    ang0 = jnp.zeros((Mp, F2), jnp.float32)
    if rand_init:
        # TODO(synk): torch uses torch.rand for the complex init; JAX PRNG differs.
        k1, k2 = jax.random.split(jax.random.PRNGKey(0))
        ang0 = ang0.at[:M, :n_freq].set(jax.random.uniform(k1, (M, n_freq), jnp.float32))
        ang0 = ang0.at[:M, Fp:Fp + n_freq].set(jax.random.uniform(k2, (M, n_freq), jnp.float32))
    else:
        ang0 = ang0.at[:M, :n_freq].set(1.0)
    ang = ang0.astype(compute_dtype)

    tprev = jnp.zeros((Mp, F2), jnp.float32)

    def istft_wave(ang_p, magp2_, w_inv_):
        frames = pallas_istft(magp2_, ang_p, w_inv_, TM, vmem_limit)[:M]
        return finalize_wave(frames.reshape(B, T, n_fft))

    @partial(jax.jit, donate_argnums=(1,))
    def gl_step(ang_p, tprev_p, magp2_, w_fwd_, w_inv_):
        wave = istft_wave(ang_p, magp2_, w_inv_)
        padded = jnp.pad(wave, ((0, 0), (start, start)), mode="reflect")
        padded = padded.astype(compute_dtype)                     # halve framing stream
        fr = gather_frames(padded).reshape(-1, n_fft)
        fr = jnp.pad(fr, ((0, Mp - fr.shape[0]), (0, 0)))
        reb, ang_new = pallas_stft_phase(fr, tprev_p, w_fwd_, momentum, TM, vmem_limit)
        return ang_new, reb

    for _ in range(n_iter):
        ang, tprev = gl_step(ang, tprev, magp2, w_fwd, w_inv)

    wave = jax.jit(istft_wave)(ang, magp2, w_inv)
    return wave.reshape(shape[:-2] + (wave.shape[-1],))


# --------------------------------------------------------------------- main --

if __name__ == "__main__":
    key = jax.random.PRNGKey(0)

    # small deterministic example consistent with a griffinlim call
    B = 2
    n_fft, hop_length, win_length = 16, 4, 16
    n_freq, n_frames = n_fft // 2 + 1, 8
    power, n_iter, momentum = 2.0, 4, 0.99
    length, rand_init = None, False

    specgram = jax.random.uniform(key, (B, n_freq, n_frames), jnp.float32,
                                  minval=0.05, maxval=1.0)
    window = _hann_window(win_length)

    # pure-JAX (jnp.fft, f32) reference of the same pipeline
    ref = griffinlim(specgram, window, n_fft, hop_length, win_length, power,
                     n_iter, momentum, length, rand_init, use_pallas=False)
    ref = jax.block_until_ready(ref)

    # Pallas path with f32 matmuls: tight correctness check vs. fft reference
    out_f32 = griffinlim(specgram, window, n_fft, hop_length, win_length, power,
                         n_iter, momentum, length, rand_init,
                         use_pallas=True, compute_dtype=jnp.float32)
    out_f32 = jax.block_until_ready(out_f32)

    # Pallas path with bf16 streams + matmuls (default fast path): looser check
    out = griffinlim(specgram, window, n_fft, hop_length, win_length, power,
                     n_iter, momentum, length, rand_init,
                     use_pallas=True, compute_dtype=jnp.bfloat16)
    out = jax.block_until_ready(out)

    expected = (B, hop_length * (n_frames - 1))
    assert ref.shape == expected and out_f32.shape == expected and out.shape == expected
    assert bool(jnp.all(jnp.isfinite(out_f32)))
    assert bool(jnp.all(jnp.isfinite(out)))
    assert bool(jnp.allclose(out_f32, ref, atol=3e-2, rtol=3e-2))
    assert bool(jnp.allclose(out, ref, atol=1e-1, rtol=1e-1))

    print("KERNEL_OK")
</pallas_src>

<mosaic_0001>
module attributes {stable_mosaic.version = 11 : i64} {
  func.func @_istft_kernel(%arg0: i32, %arg1: memref<16x256xf32, #tpu.memory_space<vmem>>, %arg2: memref<16x256xf32, #tpu.memory_space<vmem>>, %arg3: memref<256x16xf32, #tpu.memory_space<vmem>>, %arg4: memref<16x16xf32, #tpu.memory_space<vmem>>) attributes {dimension_semantics = [#tpu.dimension_semantics<parallel>], iteration_bounds = array<i64: 1>, scalar_prefetch = 0 : i64, scratch_operands = 0 : i64, tpu.core_type = #tpu.core_type<tc>, window_params = [{transform_indices = @transform_0, window_bounds = array<i64: 16, 256>}, {transform_indices = @transform_1, window_bounds = array<i64: 16, 256>}, {pipeline_mode = #tpu.pipeline_mode<synchronous>, transform_indices = @transform_2, window_bounds = array<i64: 256, 16>}, {transform_indices = @transform_3, window_bounds = array<i64: 16, 16>}]} {
    %c0 = arith.constant 0 : index
    %c0_0 = arith.constant 0 : index
    %0 = vector.load %arg1[%c0, %c0_0] : memref<16x256xf32, #tpu.memory_space<vmem>>, vector<16x256xf32>
    %c0_1 = arith.constant 0 : index
    %c0_2 = arith.constant 0 : index
    %1 = vector.load %arg2[%c0_1, %c0_2] : memref<16x256xf32, #tpu.memory_space<vmem>>, vector<16x256xf32>
    %2 = arith.mulf %0, %1 : vector<16x256xf32>
    %c0_3 = arith.constant 0 : index
    %c0_4 = arith.constant 0 : index
    %3 = vector.load %arg3[%c0_3, %c0_4] : memref<256x16xf32, #tpu.memory_space<vmem>>, vector<256x16xf32>
    %cst = arith.constant dense<0.000000e+00> : vector<16x16xf32>
    %4 = tpu.matmul %2, %3, %cst {dimension_numbers = #tpu.dot_dimension_numbers<[1], [0], [0], [1], [0, 0, 1, 1], [], []>} : vector<16x256xf32>, vector<256x16xf32>, vector<16x16xf32> -> vector<16x16xf32>
    %c0_5 = arith.constant 0 : index
    %c0_6 = arith.constant 0 : index
    %5 = vector.load %arg4[%c0_5, %c0_6] : memref<16x16xf32, #tpu.memory_space<vmem>>, vector<16x16xf32>
    tpu.vector_store %arg4[%c0_5, %c0_6], %4 {strides = array<i32>} : memref<16x16xf32, #tpu.memory_space<vmem>>, vector<16x16xf32>,
    return
  }
  func.func @transform_0(%arg0: i32) -> (i32, i32) {
    %c0_i32 = arith.constant 0 : i32
    %c0_i32_0 = arith.constant 0 : i32
    return %arg0, %c0_i32 : i32, i32
  }
  func.func @transform_1(%arg0: i32) -> (i32, i32) {
    %c0_i32 = arith.constant 0 : i32
    %c0_i32_0 = arith.constant 0 : i32
    return %arg0, %c0_i32 : i32, i32
  }
  func.func @transform_2(%arg0: i32) -> (i32, i32) {
    %c0_i32 = arith.constant 0 : i32
    %c0_i32_0 = arith.constant 0 : i32
    %c0_i32_1 = arith.constant 0 : i32
    return %c0_i32, %c0_i32_0 : i32, i32
  }
  func.func @transform_3(%arg0: i32) -> (i32, i32) {
    %c0_i32 = arith.constant 0 : i32
    %c0_i32_0 = arith.constant 0 : i32
    return %arg0, %c0_i32 : i32, i32
  }
}

module attributes {stable_mosaic.version = 11 : i64} {
  func.func @_stft_phase_kernel(%arg0: i32, %arg1: memref<16x16xf32, #tpu.memory_space<vmem>>, %arg2: memref<16x256xf32, #tpu.memory_space<vmem>>, %arg3: memref<16x256xf32, #tpu.memory_space<vmem>>, %arg4: memref<16x256xf32, #tpu.memory_space<vmem>>, %arg5: memref<16x256xf32, #tpu.memory_space<vmem>>) attributes {dimension_semantics = [#tpu.dimension_semantics<parallel>], iteration_bounds = array<i64: 1>, scalar_prefetch = 0 : i64, scratch_operands = 0 : i64, tpu.core_type = #tpu.core_type<tc>, window_params = [{transform_indices = @transform_0, window_bounds = array<i64: 16, 16>}, {pipeline_mode = #tpu.pipeline_mode<synchronous>, transform_indices = @transform_1, window_bounds = array<i64: 16, 256>}, {transform_indices = @transform_2, window_bounds = array<i64: 16, 256>}, {transform_indices = @transform_3, window_bounds = array<i64: 16, 256>}, {transform_indices = @transform_4, window_bounds = array<i64: 16, 256>}]} {
    %c0 = arith.constant 0 : index
    %c0_0 = arith.constant 0 : index
    %0 = vector.load %arg1[%c0, %c0_0] : memref<16x16xf32, #tpu.memory_space<vmem>>, vector<16x16xf32>
    %c0_1 = arith.constant 0 : index
    %c0_2 = arith.constant 0 : index
    %1 = vector.load %arg2[%c0_1, %c0_2] : memref<16x256xf32, #tpu.memory_space<vmem>>, vector<16x256xf32>
    %cst = arith.constant dense<0.000000e+00> : vector<16x256xf32>
    %2 = tpu.matmul %0, %1, %cst {dimension_numbers = #tpu.dot_dimension_numbers<[1], [0], [0], [1], [0, 0, 1, 1], [], []>} : vector<16x16xf32>, vector<16x256xf32>, vector<16x256xf32> -> vector<16x256xf32>
    %c0_3 = arith.constant 0 : index
    %c0_4 = arith.constant 0 : index
    %3 = vector.load %arg4[%c0_3, %c0_4] : memref<16x256xf32, #tpu.memory_space<vmem>>, vector<16x256xf32>
    tpu.vector_store %arg4[%c0_3, %c0_4], %2 {strides = array<i32>} : memref<16x256xf32, #tpu.memory_space<vmem>>, vector<16x256xf32>,
    %c0_5 = arith.constant 0 : index
    %c0_6 = arith.constant 0 : index
    %4 = vector.load %arg3[%c0_5, %c0_6] : memref<16x256xf32, #tpu.memory_space<vmem>>, vector<16x256xf32>
    %cst_7 = arith.constant 0.497487426 : f32
    %5 = vector.broadcast %cst_7 : f32 to vector<16x256xf32>
    %6 = arith.mulf %5, %4 : vector<16x256xf32>
    %7 = arith.subf %2, %6 : vector<16x256xf32>
    %8 = vector.extract_strided_slice %7 {offsets = [0, 0], sizes = [16, 128], strides = [1, 1]} : vector<16x256xf32> to vector<16x128xf32>
    %9 = vector.extract_strided_slice %7 {offsets = [0, 128], sizes = [16, 128], strides = [1, 1]} : vector<16x256xf32> to vector<16x128xf32>
    %10 = arith.mulf %8, %8 : vector<16x128xf32>
    %11 = arith.mulf %9, %9 : vector<16x128xf32>
    %12 = arith.addf %10, %11 : vector<16x128xf32>
    %cst_8 = arith.constant 1.000000e-16 : f32
    %13 = vector.broadcast %cst_8 : f32 to vector<16x128xf32>
    %14 = arith.addf %12, %13 : vector<16x128xf32>
    %15 = math.rsqrt %14 : vector<16x128xf32>
    %16 = arith.mulf %8, %15 : vector<16x128xf32>
    %c0_9 = arith.constant 0 : index
    %c0_10 = arith.constant 0 : index
    %17 = vector.load %arg5[%c0_9, %c0_10] : memref<16x256xf32, #tpu.memory_space<vmem>>, vector<16x128xf32>
    tpu.vector_store %arg5[%c0_9, %c0_10], %16 {strides = array<i32>} : memref<16x256xf32, #tpu.memory_space<vmem>>, vector<16x128xf32>,
    %18 = arith.mulf %9, %15 : vector<16x128xf32>
    %c0_11 = arith.constant 0 : index
    %c128 = arith.constant 128 : index
    %19 = vector.load %arg5[%c0_11, %c128] : memref<16x256xf32, #tpu.memory_space<vmem>>, vector<16x128xf32>
    tpu.vector_store %arg5[%c0_11, %c128], %18 {strides = array<i32>} : memref<16x256xf32, #tpu.memory_space<vmem>>, vector<16x128xf32>,
    return
  }
  func.func @transform_0(%arg0: i32) -> (i32, i32) {
    %c0_i32 = arith.constant 0 : i32
    %c0_i32_0 = arith.constant 0 : i32
    return %arg0, %c0_i32 : i32, i32
  }
  func.func @transform_1(%arg0: i32) -> (i32, i32) {
    %c0_i32 = arith.constant 0 : i32
    %c0_i32_0 = arith.constant 0 : i32
    %c0_i32_1 = arith.constant 0 : i32
    return %c0_i32, %c0_i32_0 : i32, i32
  }
  func.func @transform_2(%arg0: i32) -> (i32, i32) {
    %c0_i32 = arith.constant 0 : i32
    %c0_i32_0 = arith.constant 0 : i32
    return %arg0, %c0_i32 : i32, i32
  }
  func.func @transform_3(%arg0: i32) -> (i32, i32) {
    %c0_i32 = arith.constant 0 : i32
    %c0_i32_0 = arith.constant 0 : i32
    return %arg0, %c0_i32 : i32, i32
  }
  func.func @transform_4(%arg0: i32) -> (i32, i32) {
    %c0_i32 = arith.constant 0 : i32
    %c0_i32_0 = arith.constant 0 : i32
    return %arg0, %c0_i32 : i32, i32
  }
}

</mosaic_0001>

<bundles_post_ra>
// kernel: gl_step.2
= control target key start
LH: loop header
LB: loop body
LE: loop exit
PB: predicated region body
PF: predicated region fallthrough
CT: control target
= control target key end

     0   :  { %vm133_vm0 = vcmask 130048   ;;  %s356_s2 = inlined_call_operand.vmem [shape: f32[256,16], index: 2, kind: input, shape index: {}]   ;;  %s357_s0 = inlined_call_operand.vmem [shape: f32[16,256], index: 0, kind: input, shape index: {}]   ;;  %s358_s1 = inlined_call_operand.vmem [shape: f32[16,256], index: 1, kind: input, shape index: {}]   ;;  %s359_s3 = inlined_call_operand.vmem [shape: f32[16,16], index: 3, kind: output, shape index: {}]  }
   0x1   :  { %v57_v0 = vld [vmem:[%s356_s2 + $0xf8] sm:$0xff]  ;;  %v56_v2 = vld [vmem:[%s356_s2 + $0xf0] sm:$0xff]  ;;  %v55_v4 = vld [vmem:[%s356_s2 + $0xe8] sm:$0xff] }
   0x2   :  { %v41_v1 = vld [vmem:[%s356_s2 + $0x78] sm:$0xff]  ;;  %140 = vmatprep.subr.mxu0 %v57_v0  ;;  %178 = vmatprep.subr.mxu1 %v57_v0  ;;  %v40_v3 = vld [vmem:[%s356_s2 + $0x70] sm:$0xff]  ;;  %v39_v5 = vld [vmem:[%s356_s2 + $0x68] sm:$0xff] }
   0x3   :  { %141 = vmatpush3.msra.mxu0 %v41_v1  ;;  %194 = vmatpush3.msra.mxu1 %v41_v1  ;;  %v54_v6 = vld [vmem:[%s356_s2 + $0xe0] sm:$0xff]  ;;  %v53_v8 = vld [vmem:[%s356_s2 + $0xd8] sm:$0xff]  ;;  %v52_v10 = vld [vmem:[%s356_s2 + $0xd0] sm:$0xff] }
   0x4   :  { %142 = vmatprep.subr.mxu0 %v56_v2  ;;  %179 = vmatprep.subr.mxu1 %v56_v2  ;;  %v38_v7 = vld [vmem:[%s356_s2 + $0x60] sm:$0xff]  ;;  %v37_v9 = vld [vmem:[%s356_s2 + $0x58] sm:$0xff]  ;;  %v36_v11 = vld [vmem:[%s356_s2 + $0x50] sm:$0xff] }
   0x5   :  { %143 = vmatpush3.msra.mxu0 %v40_v3  ;;  %195 = vmatpush3.msra.mxu1 %v40_v3  ;;  %v51_v12 = vld [vmem:[%s356_s2 + $0xc8] sm:$0xff]  ;;  %v50_v14 = vld [vmem:[%s356_s2 + $0xc0] sm:$0xff]  ;;  %v49_v16 = vld [vmem:[%s356_s2 + $0xb8] sm:$0xff] }
   0x6   :  { %144 = vmatprep.subr.mxu0 %v55_v4  ;;  %180 = vmatprep.subr.mxu1 %v55_v4  ;;  %v35_v13 = vld [vmem:[%s356_s2 + $0x48] sm:$0xff]  ;;  %v34_v15 = vld [vmem:[%s356_s2 + $0x40] sm:$0xff]  ;;  %v33_v17 = vld [vmem:[%s356_s2 + $0x38] sm:$0xff] }
   0x7   :  { %145 = vmatpush3.msra.mxu0 %v39_v5  ;;  %196 = vmatpush3.msra.mxu1 %v39_v5  ;;  %v48_v18 = vld [vmem:[%s356_s2 + $0xb0] sm:$0xff]  ;;  %v47_v20 = vld [vmem:[%s356_s2 + $0xa8] sm:$0xff]  ;;  %v46_v22 = vld [vmem:[%s356_s2 + $0xa0] sm:$0xff] }
   0x8   :  { %146 = vmatprep.subr.mxu0 %v54_v6  ;;  %181 = vmatprep.subr.mxu1 %v54_v6  ;;  %v32_v19 = vld [vmem:[%s356_s2 + $0x30] sm:$0xff]  ;;  %v31_v21 = vld [vmem:[%s356_s2 + $0x28] sm:$0xff]  ;;  %v30_v23 = vld [vmem:[%s356_s2 + $0x20] sm:$0xff] }
   0x9   :  { %147 = vmatpush3.msra.mxu0 %v38_v7  ;;  %197 = vmatpush3.msra.mxu1 %v38_v7  ;;  %v45_v24 = vld [vmem:[%s356_s2 + $0x98] sm:$0xff]  ;;  %v44_v26 = vld [vmem:[%s356_s2 + $0x90] sm:$0xff]  ;;  %v43_v28 = vld [vmem:[%s356_s2 + $0x88] sm:$0xff] }
   0xa   :  { %148 = vmatprep.subr.mxu0 %v53_v8  ;;  %182 = vmatprep.subr.mxu1 %v53_v8  ;;  %v29_v25 = vld [vmem:[%s356_s2 + $0x18] sm:$0xff]  ;;  %v28_v27 = vld [vmem:[%s356_s2 + $0x10] sm:$0xff]  ;;  %v27_v29 = vld [vmem:[%s356_s2 + $0x8] sm:$0xff] }
   0xb   :  { %149 = vmatpush3.msra.mxu0 %v37_v9  ;;  %198 = vmatpush3.msra.mxu1 %v37_v9  ;;  %v15_v30 = vld [vmem:[%s357_s0 + $0x8] sm:$0xff]  ;;  %v17_v32 = vld [vmem:[%s357_s0 + $0x18] sm:$0xff]  ;;  %v14_v34 = vld [vmem:[%s357_s0] sm:$0xff] }
   0xc   :  { %150 = vmatprep.subr.mxu0 %v52_v10  ;;  %183 = vmatprep.subr.mxu1 %v52_v10  ;;  %v19_v31 = vld [vmem:[%s358_s1 + $0x8] sm:$0xff]  ;;  %v21_v33 = vld [vmem:[%s358_s1 + $0x18] sm:$0xff]  ;;  %v18_v35 = vld [vmem:[%s358_s1] sm:$0xff] }
   0xd   :  { %151 = vmatpush3.msra.mxu0 %v36_v11  ;;  %199 = vmatpush3.msra.mxu1 %v36_v11  ;;  %v16_v36 = vld [vmem:[%s357_s0 + $0x10] sm:$0xff]  ;;  %v42_v38 = vld [vmem:[%s356_s2 + $0x80] sm:$0xff]  ;;  %v23_v40 = vmul.f32 %v19_v31, %v15_v30  ;;  %v25_v41 = vmul.f32 %v21_v33, %v17_v32  ;;  %v22_v42 = vmul.f32 %v18_v35, %v14_v34 }
   0xe   :  { %152 = vmatprep.subr.mxu0 %v51_v12  ;;  %184 = vmatprep.subr.mxu1 %v51_v12  ;;  %v20_v37 = vld [vmem:[%s358_s1 + $0x10] sm:$0xff]  ;;  %v26_v39 = vld [vmem:[%s356_s2] sm:$0xff] }
   0xf   :  { %153 = vmatpush3.msra.mxu0 %v35_v13  ;;  %200 = vmatpush3.msra.mxu1 %v35_v13  ;;  %v24_v43 = vmul.f32 %v20_v37, %v16_v36 }
  0x10   :  { %154 = vmatprep.subr.mxu0 %v50_v14  ;;  %185 = vmatprep.subr.mxu1 %v50_v14 }
  0x11   :  { %155 = vmatpush3.msra.mxu0 %v34_v15  ;;  %201 = vmatpush3.msra.mxu1 %v34_v15 }
  0x12   :  { %156 = vmatprep.subr.mxu0 %v49_v16  ;;  %186 = vmatprep.subr.mxu1 %v49_v16 }
  0x13   :  { %157 = vmatpush3.msra.mxu0 %v33_v17  ;;  %202 = vmatpush3.msra.mxu1 %v33_v17 }
  0x14   :  { %158 = vmatprep.subr.mxu0 %v48_v18  ;;  %187 = vmatprep.subr.mxu1 %v48_v18 }
  0x15   :  { %159 = vmatpush3.msra.mxu0 %v32_v19  ;;  %203 = vmatpush3.msra.mxu1 %v32_v19 }
  0x16   :  { %160 = vmatprep.subr.mxu0 %v47_v20  ;;  %188 = vmatprep.subr.mxu1 %v47_v20 }
  0x17   :  { %161 = vmatpush3.msra.mxu0 %v31_v21  ;;  %204 = vmatpush3.msra.mxu1 %v31_v21 }
  0x18   :  { %162 = vmatprep.subr.mxu0 %v46_v22  ;;  %189 = vmatprep.subr.mxu1 %v46_v22 }
  0x19   :  { %163 = vmatpush3.msra.mxu0 %v30_v23  ;;  %205 = vmatpush3.msra.mxu1 %v30_v23 }
  0x1a   :  { %164 = vmatprep.subr.mxu0 %v45_v24  ;;  %190 = vmatprep.subr.mxu1 %v45_v24 }
  0x1b   :  { %165 = vmatpush3.msra.mxu0 %v29_v25  ;;  %206 = vmatpush3.msra.mxu1 %v29_v25 }
  0x1c   :  { %166 = vmatprep.subr.mxu0 %v44_v26  ;;  %191 = vmatprep.subr.mxu1 %v44_v26 }
  0x1d   :  { %167 = vmatpush3.msra.mxu0 %v28_v27  ;;  %207 = vmatpush3.msra.mxu1 %v28_v27 }
  0x1e   :  { %168 = vmatprep.subr.mxu0 %v43_v28  ;;  %192 = vmatprep.subr.mxu1 %v43_v28 }
  0x1f   :  { %169 = vmatpush3.msra.mxu0 %v27_v29  ;;  %208 = vmatpush3.msra.mxu1 %v27_v29 }
  0x20   :  { %170 = vmatprep.subr.mxu0 %v42_v38  ;;  %193 = vmatprep.subr.mxu1 %v42_v38 }
  0x21   :  { %171 = vmatpush3.msra.mxu0 %v26_v39  ;;  %209 = vmatpush3.msra.mxu1 %v26_v39 }
  0x22   :  { %122 = vmatprep.mubr.f32.mxu0 %v23_v40  ;;  %127 = vmatprep.mubr.f32.mxu1 %v25_v41 }
  0x23   :  { %123 = vmatmul.mubr.f32.vlgmr.msra.gmra.mxu0 %v22_v42  ;;  %128 = vmatmul.mubr.f32.vlgmr.msra.gmra.mxu1 %v24_v43 }
  0xe3   :  { %v172_v44 = vpop.f32.mrf.mxu0  ;;  %v175_v45 = vpop.f32.mrf.mxu1 }
  0xe5   :  { %v173_v46 = vpop.f32.mrf.mxu0  ;;  %v176_v47 = vpop.f32.mrf.mxu1 }
  0xe6   :  { %v174_v48 = vadd.f32 %v173_v46, %v172_v44  ;;  %v177_v49 = vadd.f32 %v176_v47, %v175_v45 }
  0xe8   :  { %134 = vst.msk [vmem:[%s359_s3] sm:$0xff] %vm133_vm0, %v174_v48  ;;  %135 = vst.msk [vmem:[%s359_s3 + $0x8] sm:$0xff] %vm133_vm0, %v177_v49 }

// kernel: gl_step.3
= control target key start
LH: loop header
LB: loop body
LE: loop exit
PB: predicated region body
PF: predicated region fallthrough
CT: control target
= control target key end

     0   :  { %s271_s0 = inlined_call_operand.vmem [shape: f32[16,16], index: 0, kind: input, shape index: {}]   ;;  %s272_s1 = inlined_call_operand.vmem [shape: f32[16,256], index: 1, kind: input, shape index: {}]   ;;  %s273_s2 = inlined_call_operand.vmem [shape: f32[16,256], index: 2, kind: input, shape index: {}, may-alias: {2,3}]   ;;  %s274_s3 = inlined_call_operand.vmem [shape: f32[16,256], index: 3, kind: output, shape index: {0}, may-alias: {2,3}]   ;;  %s275_s4 = inlined_call_operand.hbm [shape: f32[16,256], index: 4, kind: output, shape index: {1}]  }
   0x1   :  { %v22_v0 = vld [vmem:[%s272_s1 + $0x18] sm:$0xff]  ;;  %v21_v1 = vld [vmem:[%s272_s1 + $0x10] sm:$0xff]  ;;  %v20_v2 = vld [vmem:[%s272_s1 + $0x8] sm:$0xff] }
   0x2   :  { %58 = vmatprep.subr.mxu0 %v22_v0  ;;  %163 = vmatprep.subr.mxu1 %v22_v0  ;;  %v19_v3 = vld [vmem:[%s272_s1] sm:$0xff] }
   0x3   :  { %59 = vmatpush1.msra.mxu0 %v21_v1  ;;  %165 = vmatpush1.msra.mxu1 %v21_v1 }
   0x4   :  { %10 = vsyncpa [#allocation3], 0  ;;  %60 = vmatprep.subr.mxu0 %v20_v2  ;;  %164 = vmatprep.subr.mxu1 %v20_v2  ;;  %v17_v4 = vld [vmem:[%s271_s0] sm:$0xff]  ;;  %vm23_vm0 = vcmask 130048   ;;  %v18_v5 = vld [vmem:[%s271_s0 + $0x8] sm:$0xff]  ;;  %v197_v6 = vmov 0.0  }
   0x5   :  { %61 = vmatpush1.msra.mxu0 %v19_v3  ;;  %166 = vmatpush1.msra.mxu1 %v19_v3 }
   0x6   :  { %94 = vmatprep.mubr.f32.mxu0 %v197_v6  ;;  %100 = vmatprep.mubr.f32.mxu1 %v197_v6 }
   0x7   :  { %161 = vmatmul.mubr.msk.f32.vlgmr.msra.gmra.mxu0 %vm23_vm0, %v17_v4  ;;  %162 = vmatmul.mubr.msk.f32.vlgmr.msra.gmra.mxu1 %vm23_vm0, %v18_v5 }
  0xc7   :  { %v96_v7 = vpop.f32.mrf.mxu0  ;;  %v102_v8 = vpop.f32.mrf.mxu1 }
  0xc8   :  { %107 = vst [vmem:[%s274_s3] sm:$0xff] %v96_v7  ;;  %109 = vst [vmem:[%s274_s3 + $0x10] sm:$0xff] %v102_v8 }
  0xc9   :  { %v98_v9 = vpop.f32.mrf.mxu0  ;;  %v104_v10 = vpop.f32.mrf.mxu1 }
  0xca   :  { %108 = vst [vmem:[%s274_s3 + $0x8] sm:$0xff] %v98_v9  ;;  %110 = vst [vmem:[%s274_s3 + $0x18] sm:$0xff] %v104_v10  ;;  %s198_s3 = smov [#allocation2]  }
  0xcb   :  { %s148_s15 = sshll.u32 %s198_s3, 4  ;;  %s149_s15 = int_to_ptr.vmem [resolvable:$true] %s148_s15 }
  0xcc   :  { %p180_p1 = scmp.lt.s32.totalorder %s149_s15, %s149_s15 }
  0xd1   :  { %v111_v11 = vld [vmem:[%s273_s2] sm:$0xff]  ;;  %v113_v12 = vld [vmem:[%s273_s2 + $0x10] sm:$0xff]  ;;  %v112_v15 = vld [vmem:[%s273_s2 + $0x8] sm:$0xff] }
  0xd2   :  { %v115_v13 = vmul.f32 0.49748743, %v111_v11  ;;  %v117_v14 = vmul.f32 0.49748743, %v113_v12  ;;  %v114_v16 = vld [vmem:[%s273_s2 + $0x18] sm:$0xff]  ;;  %s175_s2 = scalar_lea.vmem %s149_s15, 512 }
  0xd3   :  { %v116_v19 = vmul.f32 0.49748743, %v112_v15  ;;  %v118_v20 = vmul.f32 0.49748743, %v114_v16  ;;  %p176_p0 = scmp.ne.s32.totalorder %s149_s15, %s175_s2  ;;  %p181_p2 = scmp.lt.s32.totalorder %s175_s2, %s175_s2 }
  0xd4   :  { %v119_v17 = vsub.f32 %v96_v7, %v115_v13  ;;  %v121_v18 = vsub.f32 %v102_v8, %v117_v14 }
  0xd5   :  { %v120_v21 = vsub.f32 %v98_v9, %v116_v19  ;;  %v122_v22 = vsub.f32 %v104_v10, %v118_v20  ;;  %p182_p3 = por %p181_p2, %p180_p1 }
  0xd6   :  { %v123_v23 = vmul.f32 %v119_v17, %v119_v17  ;;  %v124_v24 = vmul.f32 %v121_v18, %v121_v18 }
  0xd7   :  { %v125_v25 = vmul.f32 %v120_v21, %v120_v21  ;;  %v126_v26 = vmul.f32 %v122_v22, %v122_v22  ;;  %p183_p4 = pnand %p182_p3, %p176_p0 }
  0xd9   :  { %v127_v27 = vadd.f32 %v125_v25, %v123_v23  ;;  %v128_v28 = vadd.f32 %v126_v26, %v124_v24 }
  0xdb   :  { %v129_v29 = vadd.f32 1e-16, %v127_v27  ;;  %v130_v30 = vadd.f32 1e-16, %v128_v28 }
  0xdd   :  { %171 = vrsqrt.f32 %v129_v29 }
  0xde   :  { %173 = vrsqrt.f32 %v130_v30 }
  0xea   :  { %v172_v31 = vpop.eup %171 }
  0xeb   :  { %v174_v32 = vpop.eup %173  ;;  %v137_v33 = vmul.f32 %v172_v31, %v120_v21  ;;  %v133_v34 = vmul.f32 %v172_v31, %v119_v17 }
  0xec   :  { %v138_v35 = vmul.f32 %v174_v32, %v122_v22  ;;  %v134_v36 = vmul.f32 %v174_v32, %v121_v18 }
  0xed   :  { %139 = vst [vmem:[#allocation2 + $0x8] sm:$0xff] %v137_v33  ;;  %135 = vst [vmem:[#allocation2] sm:$0xff] %v133_v34 }
  0xee   :  { %140 = vst [vmem:[#allocation2 + $0x18] sm:$0xff] %v138_v35  ;;  %136 = vst [vmem:[#allocation2 + $0x10] sm:$0xff] %v134_v36 }
  0xef   :  { %186 = shalt.err (!%p183_p4)
}
  0xf0   :  { %s199_s16 = smov 256   ;;  %s200_s17 = smov 16  }
  0xf1   :  { %154 = dma.vmem_to_hbm [thread:$0]  %s149_s15, 512, %s275_s4, [#allocation3], %s199_s16, %s199_s16, %s200_s17  }
  0xf2   :  { %195 = dma.done.wait [#allocation3], 512  }
  0xf3   :  { %196 = vsyncadd [#allocation3], 4294966784 }
  0xf4   :  { %160 = vsyncpa [#allocation3], 1 }

</bundles_post_ra>
